<compile_context>
chip_gen: v5e
topology: v5e:2x2
jax: 0.10.0
libtpu: 0.0.40
codegen_flags: <defaults>
</compile_context>

<pallas_src>
import math
import functools

import jax
import jax.numpy as jnp
from jax import lax
from jax.experimental import pallas as pl
from jax.experimental.pallas import tpu as pltpu


# ----------------------------------------------------------------------------
# Helpers
# ----------------------------------------------------------------------------

def _pick_tile(n, candidates):
    """Largest candidate that divides n, else the full dimension."""
    for c in candidates:
        if n % c == 0:
            return c
    return n


MASK_VALUE = -1e30  # finite "minus infinity" for the online softmax


# ----------------------------------------------------------------------------
# Tiled linear: y = x @ w_kn  (weights pre-transposed to (K, N) at init)
# ----------------------------------------------------------------------------

def _matmul_kernel(x_ref, w_ref, o_ref, acc_ref):
    @pl.when(pl.program_id(2) == 0)
    def _():
        acc_ref[...] = jnp.zeros_like(acc_ref)

    acc_ref[...] += jnp.dot(x_ref[...], w_ref[...],
                            preferred_element_type=jnp.float32)

    @pl.when(pl.program_id(2) == pl.num_programs(2) - 1)
    def _():
        o_ref[...] = acc_ref[...].astype(o_ref.dtype)


def linear(x2d, w_kn):
    """x2d: (M, K), w_kn: (K, N) -> (M, N).  Standard NN MXU contraction."""
    M, K = x2d.shape
    K2, N = w_kn.shape
    assert K == K2
    tm = _pick_tile(M, (256, 128, 64, 32, 16, 8))
    tn = _pick_tile(N, (512, 256, 128))
    tk = _pick_tile(K, (512, 256, 128))
    return pl.pallas_call(
        _matmul_kernel,
        out_shape=jax.ShapeDtypeStruct((M, N), x2d.dtype),
        grid=(M // tm, N // tn, K // tk),
        in_specs=[
            pl.BlockSpec((tm, tk), lambda i, j, k: (i, k)),
            pl.BlockSpec((tk, tn), lambda i, j, k: (k, j)),
        ],
        out_specs=pl.BlockSpec((tm, tn), lambda i, j, k: (i, j)),
        scratch_shapes=[pltpu.VMEM((tm, tn), jnp.float32)],
        compiler_params=pltpu.CompilerParams(
            dimension_semantics=("parallel", "parallel", "arbitrary")),
    )(x2d, w_kn)


# ----------------------------------------------------------------------------
# In-place KV-cache update: direct HBM->HBM DMA of only the new rows.
# Cache layout: (max_batch, Hkv, max_seq, Dh); new rows: (B, Hkv, S, Dh).
# ----------------------------------------------------------------------------

def _kv_cache_update_kernel(sp_ref, kn_ref, vn_ref, ck_in, cv_in,
                            ck_out, cv_out, sem):
    del ck_in, cv_in  # data carried through input/output aliasing
    sp = sp_ref[0]
    b, hkv, s, dh = kn_ref.shape
    dst_k = ck_out.at[pl.ds(0, b), pl.ds(0, hkv), pl.ds(sp, s), pl.ds(0, dh)]
    dst_v = cv_out.at[pl.ds(0, b), pl.ds(0, hkv), pl.ds(sp, s), pl.ds(0, dh)]
    ck = pltpu.make_async_copy(kn_ref, dst_k, sem.at[0])
    cv = pltpu.make_async_copy(vn_ref, dst_v, sem.at[1])
    ck.start()
    cv.start()
    ck.wait()
    cv.wait()


@functools.partial(jax.jit, donate_argnums=(3, 4))
def kv_cache_update(sp, k_new, v_new, cache_k, cache_v):
    """cache[:B, :, start_pos:start_pos+S] = new, without touching the rest."""
    return pl.pallas_call(
        _kv_cache_update_kernel,
        out_shape=(jax.ShapeDtypeStruct(cache_k.shape, cache_k.dtype),
                   jax.ShapeDtypeStruct(cache_v.shape, cache_v.dtype)),
        in_specs=[
            pl.BlockSpec(memory_space=pltpu.MemorySpace.SMEM),  # start_pos
            pl.BlockSpec(memory_space=pl.ANY),                  # k_new (HBM)
            pl.BlockSpec(memory_space=pl.ANY),                  # v_new (HBM)
            pl.BlockSpec(memory_space=pl.ANY),                  # cache_k (HBM)
            pl.BlockSpec(memory_space=pl.ANY),                  # cache_v (HBM)
        ],
        out_specs=(pl.BlockSpec(memory_space=pl.ANY),
                   pl.BlockSpec(memory_space=pl.ANY)),
        scratch_shapes=[pltpu.SemaphoreType.DMA((2,))],
        input_output_aliases={3: 0, 4: 1},
    )(sp, k_new, v_new, cache_k, cache_v)


# ----------------------------------------------------------------------------
# Flash-style attention over the full (fixed-shape) KV cache.
#   q grouped by KV head:  (B, Hkv, n_rep, S, Dh)
#   cache layout:          (max_batch, Hkv, max_seq, Dh)
#   output:                (B, S, Hq*Dh) lane-dense
# ----------------------------------------------------------------------------

def _flash_attn_kernel(kvlen_ref, q_ref, k_ref, v_ref, o_ref,
                       qg_sc, m_sc, l_sc, acc_sc, *, t_blk):
    t = pl.program_id(2)
    kv_len = kvlen_ref[0]

    @pl.when(t == 0)
    def _():
        hkv, n_rep, sq, dh = q_ref.shape
        # Layout-preserving merge (sq % 8 == 0): (Hkv, n_rep, Sq, Dh) ->
        # (Hkv, n_rep*Sq, Dh).  q already carries the 1/sqrt(Dh) scale.
        qg_sc[...] = q_ref[...].reshape(hkv, n_rep * sq, dh)
        m_sc[...] = jnp.full(m_sc.shape, MASK_VALUE, m_sc.dtype)
        l_sc[...] = jnp.zeros(l_sc.shape, l_sc.dtype)
        acc_sc[...] = jnp.zeros(acc_sc.shape, acc_sc.dtype)

    @pl.when(t * t_blk < kv_len)          # skip fully out-of-range kv blocks
    def _():
        q = qg_sc[...]                    # (Hkv, M, Dh)   bf16, pre-scaled
        k = k_ref[...]                    # (Hkv, Tb, Dh)  bf16
        v = v_ref[...]                    # (Hkv, Tb, Dh)  bf16

        # Batched over KV groups; M = n_rep * Sq keeps the MXU M dim fat.
        s = jnp.einsum("gmd,gtd->gmt", q, k,
                       preferred_element_type=jnp.float32)

        # Mask cache positions >= kv_len (zero-initialized / stale rows).
        pos = t * t_blk + lax.broadcasted_iota(jnp.int32, s.shape, 2)
        s = jnp.where(pos < kv_len, s, MASK_VALUE)

        # Online softmax (stats in f32).  No causal mask, matching the
        # reference PyTorch module (attends to all cached positions < kv_len).
        m_prev = m_sc[...]
        m_new = jnp.maximum(m_prev, jnp.max(s, axis=-1, keepdims=True))
        alpha = jnp.exp(m_prev - m_new)
        p = jnp.exp(s - m_new)
        l_sc[...] = alpha * l_sc[...] + jnp.sum(p, axis=-1, keepdims=True)
        pv = jnp.einsum("gmt,gtd->gmd", p.astype(v.dtype), v,
                        preferred_element_type=jnp.float32)
        acc_sc[...] = alpha * acc_sc[...] + pv
        m_sc[...] = m_new

    @pl.when(t == pl.num_programs(2) - 1)
    def _():
        hkv, n_rep, sq, dh = q_ref.shape
        inv_l = pl.reciprocal(l_sc[...], approx=True)     # EUP, off the VPU
        o = acc_sc[...] * inv_l                           # (Hkv, M, Dh) f32
        # Static, sublane-aligned slice copies into the lane-dense output slab
        # (query head h = g*n_rep + r occupies columns [h*Dh, (h+1)*Dh)).
        for g in range(hkv):
            for r in range(n_rep):
                h = g * n_rep + r
                o_ref[:, h * dh:(h + 1) * dh] = (
                    o[g, r * sq:(r + 1) * sq, :].astype(o_ref.dtype))


def attention(kv_len, q_g, cache_k, cache_v):
    """q_g: (B, Hkv, n_rep, S, Dh); caches: (MAXB, Hkv, MAXSEQ, Dh).

    Returns (B, S, Hq*Dh).  kv_len: (1,) int32 = start_pos + S.
    """
    B, Hkv, n_rep, S, Dh = q_g.shape
    _, _, MAXSEQ, _ = cache_k.shape
    Hq = Hkv * n_rep

    # Conservative tile sizes: fit the v7x 64 MiB / v5e 16 MiB scoped budgets
    # (sq_blk <= 128, t_blk <= 256); deepen buffering on v6e if desired.
    sq_blk = _pick_tile(S, (128, 64, 32, 16, 8))
    t_blk = _pick_tile(MAXSEQ, (256, 128, 64, 32, 16, 8))
    n_sq = S // sq_blk
    n_kv = MAXSEQ // t_blk
    M = n_rep * sq_blk

    def q_map(b, sq, t, kvlen_ref):
        return (b, 0, 0, sq, 0)

    def kv_map(b, sq, t, kvlen_ref):
        # Clamp so out-of-range steps re-use the last live block (DMA elided
        # when the block index repeats); their compute is skipped in-kernel.
        last = jnp.maximum(kvlen_ref[0] - 1, 0) // t_blk
        return (b, 0, jnp.minimum(t, last), 0)

    def o_map(b, sq, t, kvlen_ref):
        return (b, sq, 0)

    kernel = functools.partial(_flash_attn_kernel, t_blk=t_blk)

    return pl.pallas_call(
        kernel,
        out_shape=jax.ShapeDtypeStruct((B, S, Hq * Dh), q_g.dtype),
        grid_spec=pltpu.PrefetchScalarGridSpec(
            num_scalar_prefetch=1,
            grid=(B, n_sq, n_kv),
            in_specs=[
                pl.BlockSpec((None, Hkv, n_rep, sq_blk, Dh), q_map),
                pl.BlockSpec((None, Hkv, t_blk, Dh), kv_map),
                pl.BlockSpec((None, Hkv, t_blk, Dh), kv_map),
            ],
            out_specs=pl.BlockSpec((None, sq_blk, Hq * Dh), o_map),
            scratch_shapes=[
                pltpu.VMEM((Hkv, M, Dh), q_g.dtype),    # grouped, scaled q
                pltpu.VMEM((Hkv, M, 1), jnp.float32),   # running max
                pltpu.VMEM((Hkv, M, 1), jnp.float32),   # running sum
                pltpu.VMEM((Hkv, M, Dh), jnp.float32),  # accumulator
            ]),
        compiler_params=pltpu.CompilerParams(
            dimension_semantics=("parallel", "parallel", "arbitrary"),
            vmem_limit_bytes=64 * 1024 * 1024),
    )(kv_len, q_g, cache_k, cache_v)


# ----------------------------------------------------------------------------
# RoPE (plain JAX glue outside the kernels)
# ----------------------------------------------------------------------------

def apply_rotary_embeddings(x, cos, sin):
    """x: (B, S, H, Dh); cos/sin: (S, Dh//2).  Consecutive pairs = (re, im)."""
    xf = x.astype(jnp.float32)
    x0 = xf[..., 0::2]
    x1 = xf[..., 1::2]
    c = cos[None, :, None, :]
    s = sin[None, :, None, :]
    r0 = x0 * c - x1 * s
    r1 = x0 * s + x1 * c
    return jnp.stack([r0, r1], axis=-1).reshape(x.shape).astype(x.dtype)


def rope_cos_sin(head_dim, start_pos, seq_len, theta=10000.0):
    inv = 1.0 / (theta ** (jnp.arange(0, head_dim, 2, dtype=jnp.float32) / head_dim))
    t = jnp.arange(start_pos, start_pos + seq_len, dtype=jnp.float32)
    freqs = jnp.outer(t, inv)          # (S, Dh//2)
    return jnp.cos(freqs), jnp.sin(freqs)


# ----------------------------------------------------------------------------
# Module wrapper
# ----------------------------------------------------------------------------

class SelfAttentionPallas:
    def __init__(self, key, dim, n_heads, n_kv_heads, max_batch, max_seq,
                 dtype=jnp.bfloat16):
        self.n_heads_q = n_heads
        self.n_kv_heads = n_kv_heads
        self.n_rep = n_heads // n_kv_heads
        self.head_dim = dim // n_heads
        self.dtype = dtype
        k1, k2, k3, k4 = jax.random.split(key, 4)

        def init(k, o, i):
            return (jax.random.normal(k, (o, i), jnp.float32) * 0.1).astype(dtype)

        # Original (out, in) PyTorch-layout weights (used by the reference).
        self.wq = init(k1, n_heads * self.head_dim, dim)
        self.wk = init(k2, n_kv_heads * self.head_dim, dim)
        self.wv = init(k3, n_kv_heads * self.head_dim, dim)
        self.wo = init(k4, dim, n_heads * self.head_dim)

        # One-time trace-time transposes: (K, N) layout for the MXU, fused QKV.
        self.w_qkv_t = jnp.concatenate([self.wq, self.wk, self.wv], axis=0).T
        self.wo_t = self.wo.T

        # KV cache stored grouped by KV head: (MAXB, Hkv, MAXSEQ, Dh).
        self.cache_k = jnp.zeros(
            (max_batch, n_kv_heads, max_seq, self.head_dim), dtype)
        self.cache_v = jnp.zeros(
            (max_batch, n_kv_heads, max_seq, self.head_dim), dtype)

    def __call__(self, x, start_pos, cos, sin):
        B, S, D = x.shape
        Hq, Hkv, Dh, n_rep = self.n_heads_q, self.n_kv_heads, self.head_dim, self.n_rep
        q_dim, kv_dim = Hq * Dh, Hkv * Dh
        x = x.astype(self.dtype)

        # Fused QKV projection (single tiled Pallas matmul, NN MXU form).
        qkv = linear(x.reshape(B * S, D), self.w_qkv_t)
        q = qkv[:, :q_dim].reshape(B, S, Hq, Dh)
        k = qkv[:, q_dim:q_dim + kv_dim].reshape(B, S, Hkv, Dh)
        v = qkv[:, q_dim + kv_dim:].reshape(B, S, Hkv, Dh)

        # TODO(synk): fuse RoPE into the projection epilogue with pltpu.roll.
        q = apply_rotary_embeddings(q, cos, sin)
        k = apply_rotary_embeddings(k, cos, sin)

        # Group q by KV head and fold the softmax scale (fused by XLA with the
        # RoPE elementwise pass — no extra HBM round trip).
        scale = 1.0 / math.sqrt(Dh)
        q_g = (q.astype(jnp.float32) * scale).astype(self.dtype)
        q_g = q_g.reshape(B, S, Hkv, n_rep, Dh).transpose(0, 2, 3, 1, 4)

        # New K/V rows in the grouped cache layout (B, Hkv, S, Dh).
        k_g = k.transpose(0, 2, 1, 3)
        v_g = v.transpose(0, 2, 1, 3)

        # In-place KV-cache update (direct HBM->HBM DMA of only the new rows).
        sp = jnp.asarray([start_pos], jnp.int32)
        self.cache_k, self.cache_v = kv_cache_update(
            sp, k_g, v_g, self.cache_k, self.cache_v)

        # Attention over the full fixed-shape cache; kv_len masks unused rows.
        kv_len = jnp.asarray([start_pos + S], jnp.int32)
        out = attention(kv_len, q_g, self.cache_k, self.cache_v)  # (B,S,Hq*Dh)

        out = linear(out.reshape(B * S, q_dim), self.wo_t).reshape(B, S, D)
        return out


# ----------------------------------------------------------------------------
# Pure-JAX reference (mirrors the PyTorch forward) for correctness checking
# ----------------------------------------------------------------------------

def reference_forward(m, cache_k, cache_v, x, start_pos, cos, sin):
    B, S, D = x.shape
    xf = x.astype(jnp.float32)
    wq = m.wq.astype(jnp.float32)
    wk = m.wk.astype(jnp.float32)
    wv = m.wv.astype(jnp.float32)
    wo = m.wo.astype(jnp.float32)
    q = (xf @ wq.T).reshape(B, S, m.n_heads_q, m.head_dim)
    k = (xf @ wk.T).reshape(B, S, m.n_kv_heads, m.head_dim)
    v = (xf @ wv.T).reshape(B, S, m.n_kv_heads, m.head_dim)
    q = apply_rotary_embeddings(q, cos, sin)
    k = apply_rotary_embeddings(k, cos, sin)
    cache_k = lax.dynamic_update_slice(cache_k, k, (0, start_pos, 0, 0))
    cache_v = lax.dynamic_update_slice(cache_v, v, (0, start_pos, 0, 0))
    T = start_pos + S
    kc = jnp.repeat(cache_k[:B, :T], m.n_rep, axis=2)
    vc = jnp.repeat(cache_v[:B, :T], m.n_rep, axis=2)
    qh = jnp.transpose(q, (0, 2, 1, 3))
    kh = jnp.transpose(kc, (0, 2, 3, 1))
    vh = jnp.transpose(vc, (0, 2, 1, 3))
    scores = jnp.matmul(qh, kh) / math.sqrt(m.head_dim)
    attn = jax.nn.softmax(scores, axis=-1)
    out = jnp.matmul(attn, vh)
    out = jnp.transpose(out, (0, 2, 1, 3)).reshape(B, S, -1)
    return out @ wo.T, cache_k, cache_v


# ----------------------------------------------------------------------------
# Main
# ----------------------------------------------------------------------------

if __name__ == "__main__":
    # Small ModelArgs-consistent shapes: dim=32, n_heads=4, n_kv_heads=2 =>
    # head_dim=8, n_rep=2; batch=2, seq_len=8, max_seq=16.
    B, S, DIM = 2, 8, 32
    N_HEADS, N_KV_HEADS = 4, 2
    MAX_BATCH, MAX_SEQ = 2, 16

    key = jax.random.PRNGKey(0)
    k_params, k_x0, k_x1 = jax.random.split(key, 3)
    model = SelfAttentionPallas(k_params, DIM, N_HEADS, N_KV_HEADS,
                                MAX_BATCH, MAX_SEQ, dtype=jnp.bfloat16)

    # Reference cache kept in the standard (B, T, Hkv, Dh) layout, f32.
    ref_ck = jnp.zeros((MAX_BATCH, MAX_SEQ, N_KV_HEADS, DIM // N_HEADS),
                       jnp.float32)
    ref_cv = jnp.zeros_like(ref_ck)

    # Two chunks: prefill at position 0, then a second chunk at position S
    # (exercises the cache carry / in-place update / masked-tail path).
    for start_pos, kx in ((0, k_x0), (S, k_x1)):
        x = jax.random.normal(kx, (B, S, DIM), jnp.float32).astype(jnp.bfloat16)
        cos, sin = rope_cos_sin(model.head_dim, start_pos, S)

        out = jax.block_until_ready(model(x, start_pos, cos, sin))
        ref, ref_ck, ref_cv = reference_forward(
            model, ref_ck, ref_cv, x, start_pos, cos, sin)

        assert out.shape == (B, S, DIM)
        out_f32 = out.astype(jnp.float32)
        max_err = float(jnp.max(jnp.abs(out_f32 - ref)))
        assert jnp.allclose(out_f32, ref, atol=3e-2, rtol=6e-2), \
            f"mismatch vs reference at start_pos={start_pos}, max_err={max_err}"

    print("KERNEL_OK")
</pallas_src>

<mosaic_0001>
module attributes {stable_mosaic.version = 11 : i64} {
  func.func @_matmul_kernel(%arg0: i32, %arg1: i32, %arg2: i32, %arg3: memref<16x32xbf16, #tpu.memory_space<vmem>>, %arg4: memref<32x64xbf16, #tpu.memory_space<vmem>>, %arg5: memref<16x64xbf16, #tpu.memory_space<vmem>>, %arg6: memref<16x64xf32, #tpu.memory_space<vmem>>) attributes {dimension_semantics = [#tpu.dimension_semantics<parallel>, #tpu.dimension_semantics<parallel>, #tpu.dimension_semantics<arbitrary>], iteration_bounds = array<i64: 1, 1, 1>, scalar_prefetch = 0 : i64, scratch_operands = 1 : i64, tpu.core_type = #tpu.core_type<tc>, window_params = [{transform_indices = @transform_0, window_bounds = array<i64: 16, 32>}, {transform_indices = @transform_1, window_bounds = array<i64: 32, 64>}, {transform_indices = @transform_2, window_bounds = array<i64: 16, 64>}]} {
    %c0_i32 = arith.constant 0 : i32
    %0 = arith.cmpi eq, %arg2, %c0_i32 : i32
    %1 = arith.extui %0 : i1 to i32
    %c0_i32_0 = arith.constant 0 : i32
    %2 = arith.cmpi ne, %1, %c0_i32_0 : i32
    scf.if %2 {
      %cst_10 = arith.constant 0.000000e+00 : f32
      %12 = vector.broadcast %cst_10 : f32 to vector<16x64xf32>
      %c0_11 = arith.constant 0 : index
      %c0_12 = arith.constant 0 : index
      %13 = vector.load %arg6[%c0_11, %c0_12] : memref<16x64xf32, #tpu.memory_space<vmem>>, vector<16x64xf32>
      tpu.vector_store %arg6[%c0_11, %c0_12], %12 {strides = array<i32>} : memref<16x64xf32, #tpu.memory_space<vmem>>, vector<16x64xf32>,
    } else {
    }
    %c0 = arith.constant 0 : index
    %c0_1 = arith.constant 0 : index
    %3 = vector.load %arg6[%c0, %c0_1] : memref<16x64xf32, #tpu.memory_space<vmem>>, vector<16x64xf32>
    %c0_2 = arith.constant 0 : index
    %c0_3 = arith.constant 0 : index
    %4 = vector.load %arg3[%c0_2, %c0_3] : memref<16x32xbf16, #tpu.memory_space<vmem>>, vector<16x32xbf16>
    %c0_4 = arith.constant 0 : index
    %c0_5 = arith.constant 0 : index
    %5 = vector.load %arg4[%c0_4, %c0_5] : memref<32x64xbf16, #tpu.memory_space<vmem>>, vector<32x64xbf16>
    %cst = arith.constant dense<0.000000e+00> : vector<16x64xf32>
    %6 = tpu.matmul %4, %5, %cst {dimension_numbers = #tpu.dot_dimension_numbers<[1], [0], [0], [1], [0, 0, 1, 1], [], []>} : vector<16x32xbf16>, vector<32x64xbf16>, vector<16x64xf32> -> vector<16x64xf32>
    %7 = arith.addf %3, %6 : vector<16x64xf32>
    %c0_6 = arith.constant 0 : index
    %c0_7 = arith.constant 0 : index
    %8 = vector.load %arg6[%c0_6, %c0_7] : memref<16x64xf32, #tpu.memory_space<vmem>>, vector<16x64xf32>
    tpu.vector_store %arg6[%c0_6, %c0_7], %7 {strides = array<i32>} : memref<16x64xf32, #tpu.memory_space<vmem>>, vector<16x64xf32>,
    %c0_i32_8 = arith.constant 0 : i32
    %9 = arith.cmpi eq, %arg2, %c0_i32_8 : i32
    %10 = arith.extui %9 : i1 to i32
    %c0_i32_9 = arith.constant 0 : i32
    %11 = arith.cmpi ne, %10, %c0_i32_9 : i32
    scf.if %11 {
      %c0_10 = arith.constant 0 : index
      %c0_11 = arith.constant 0 : index
      %12 = vector.load %arg6[%c0_10, %c0_11] : memref<16x64xf32, #tpu.memory_space<vmem>>, vector<16x64xf32>
      %13 = arith.truncf %12 : vector<16x64xf32> to vector<16x64xbf16>
      %c0_12 = arith.constant 0 : index
      %c0_13 = arith.constant 0 : index
      %14 = vector.load %arg5[%c0_12, %c0_13] : memref<16x64xbf16, #tpu.memory_space<vmem>>, vector<16x64xbf16>
      tpu.vector_store %arg5[%c0_12, %c0_13], %13 {strides = array<i32>} : memref<16x64xbf16, #tpu.memory_space<vmem>>, vector<16x64xbf16>,
    } else {
    }
    return
  }
  func.func @transform_0(%arg0: i32, %arg1: i32, %arg2: i32) -> (i32, i32) {
    %c0_i32 = arith.constant 0 : i32
    return %arg0, %arg2 : i32, i32
  }
  func.func @transform_1(%arg0: i32, %arg1: i32, %arg2: i32) -> (i32, i32) {
    %c0_i32 = arith.constant 0 : i32
    return %arg2, %arg1 : i32, i32
  }
  func.func @transform_2(%arg0: i32, %arg1: i32, %arg2: i32) -> (i32, i32) {
    %c0_i32 = arith.constant 0 : i32
    return %arg0, %arg1 : i32, i32
  }
}

</mosaic_0001>

<bundles_post_ra>
// kernel: tpu_custom_call.1
= control target key start
LH: loop header
LB: loop body
LE: loop exit
PB: predicated region body
PF: predicated region fallthrough
CT: control target
= control target key end

     0   :  { %7 = vsyncpa [#allocation4], 0  ;;  %s273_s0 = inlined_call_operand.hbm [shape: bf16[16,32], index: 0, kind: input, shape index: {}]   ;;  %s274_s1 = inlined_call_operand.hbm [shape: bf16[32,64], index: 1, kind: input, shape index: {}]   ;;  %s275_s2 = inlined_call_operand.hbm [shape: bf16[16,64], index: 2, kind: output, shape index: {}]  }
   0x1   :  { %8 = vsyncpa [#allocation7], 0 }
   0x2   :  { %9 = vsyncpa [#allocation5], 0  ;;  %s14_s11 = sshll.u32 %s273_s0, 4  ;;  %s230_s12 = smov [#allocation3]   ;;  %s15_s11 = int_to_ptr.hbm [resolvable:$true] %s14_s11 }
   0x3   :  { %s16_s13 = sshll.u32 %s230_s12, 4  ;;  %s27_s16 = sshll.u32 %s274_s1, 4  ;;  %s17_s13 = int_to_ptr.vmem [resolvable:$true] %s16_s13  ;;  %s28_s16 = int_to_ptr.hbm [resolvable:$true] %s27_s16 }
   0x4   :  { %s231_s17 = smov 64   ;;  %s232_s18 = smov 4  }
   0x5   :  { %22 = dma.hbm_to_vmem [thread:$0]  %s15_s11, 128, %s17_s13, [#allocation4], %s231_s17, %s231_s17, %s232_s18  }
   0x6   :  { %s233_s19 = smov [#allocation6]  }
   0x7   :  { %s29_s20 = sshll.u32 %s233_s19, 4  ;;  %s30_s20 = int_to_ptr.vmem [resolvable:$true] %s29_s20 }
   0x8   :  { %35 = dma.hbm_to_vmem [thread:$0]  %s28_s16, 256, %s30_s20, [#allocation7], %s231_s17, %s231_s17, %s232_s18  }
   0x9   :  { %224 = dma.done.wait [#allocation4], 128  }
   0xa   :  { %225 = vsyncadd [#allocation4], 4294967168 }
   0xb   :  { %226 = dma.done.wait [#allocation7], 256  }
   0xc   :  { %227 = vsyncadd [#allocation7], 4294967040  ;;  %vm49_vm0 = vcmask 523264   ;;  %v234_v0 = vmov 0.0   ;;  %v145_v1 = vld [vmem:[#allocation6 + $0x8] sm:$0xff]  ;;  %v144_v2 = vld [vmem:[#allocation6] sm:$0xff] }
   0xd   :  { %50 = vst.msk [vmem:[#allocation2] sm:$0xff] %vm49_vm0, %v234_v0  ;;  %87 = vmatpush.bf16.msra.mxu0 %v145_v1  ;;  %v143_v3 = vld [vmem:[#allocation3] sm:$0xff]  ;;  %vm77_vm1 = vcmask 261120   ;;  %vm107_vm2 = vcmask 519168   ;;  %s235_s0 = smov [#allocation8]   ;;  %s116_s23 = sshll.u32 %s275_s2, 4  ;;  %s117_s23 = int_to_ptr.hbm [resolvable:$true] %s116_s23 }
   0xe   :  { %51 = vst.msk [vmem:[#allocation2 + $0x8] sm:$0xff] %vm49_vm0, %v234_v0  ;;  %s114_s1 = sshll.u32 %s235_s0, 4  ;;  %s115_s1 = int_to_ptr.vmem [resolvable:$true] %s114_s1 }
  0x11   :  { %88 = vmatpush.bf16.msra.mxu0 %v144_v2 }
  0x14   :  { %142 = vmatmul.msk.bf16.vlgmr.msra.gmra.mxu0 %vm77_vm1, %v143_v3  ;;  %v52_v4 = vld [vmem:[#allocation2] sm:$0xff] }
  0x15   :  { %v53_v7 = vld [vmem:[#allocation2 + $0x8] sm:$0xff] }
  0x91   :  { %v90_v5 = vpop.f32.mrf.mxu0 }
  0x92   :  { %v95_v6 = vadd.f32 %v90_v5, %v52_v4 }
  0x94   :  { %98 = vst.msk [vmem:[#allocation2] sm:$0xff] %vm49_vm0, %v95_v6 }
  0x99   :  { %v92_v8 = vpop.f32.mrf.mxu0 }
  0x9a   :  { %v96_v9 = vadd.f32 %v92_v8, %v53_v7 }
  0x9b   :  { %v103_v10 = vld [vmem:[#allocation2] sm:$0xff] }
  0x9c   :  { %99 = vst.msk [vmem:[#allocation2 + $0x8] sm:$0xff] %vm49_vm0, %v96_v9  ;;  %v105_v11 = vpack.c.bf16 %v103_v10, %v103_v10 }
  0x9e   :  { %108 = vst.msk [vmem:[#allocation8] sm:$0xf] %vm107_vm2, %v105_v11 }
  0xa3   :  { %v104_v12 = vld [vmem:[#allocation2 + $0x8] sm:$0xff] }
  0xa4   :  { %v106_v13 = vpack.c.bf16 %v104_v12, %v104_v12 }
  0xa6   :  { %109 = vst.msk [vmem:[#allocation8 + $0x4] sm:$0xf] %vm107_vm2, %v106_v13 }
  0xa7   :  { %122 = dma.vmem_to_hbm [thread:$0]  %s115_s1, 128, %s117_s23, [#allocation5], %s231_s17, %s231_s17, %s232_s18  }
  0xa8   :  { %228 = dma.done.wait [#allocation5], 128  }
  0xa9   :  { %229 = vsyncadd [#allocation5], 4294967168 }
  0xaa   :  { %127 = vsyncpa [#allocation4], 1 }
  0xab   :  { %128 = vsyncpa [#allocation7], 1 }
  0xac   :  { %129 = vsyncpa [#allocation5], 1 }

</bundles_post_ra>
